<compile_context>
chip_gen: v6e
topology: v6e:2x2x1
jax: 0.10.0
libtpu: 0.0.40
codegen_flags: <defaults>
</compile_context>

<pallas_src>
import jax
import jax.numpy as jnp
from jax.experimental import pallas as pl
from jax.experimental.pallas import tpu as pltpu


def _round_up(x, m):
    return (x + m - 1) // m * m


def _cdiv(a, b):
    return -(-a // b)


# ---------- Pass 1: collapsed-K conv matmul -> per-tile BN partial stats ------
def _stats_kernel(p_ref, w_ref, stats_ref):
    # p_ref    : [tile_rows, P*Kp]   im2col patches, P pixels packed per row
    # w_ref    : [P*Kp, P*Cout]      block-diagonal weights kron(I_P, W)
    # stats_ref: [8, P*Cout]         row 0 = sum(conv), row 1 = sum(conv^2)
    y = jnp.dot(p_ref[...], w_ref[...], preferred_element_type=jnp.float32)
    s = jnp.sum(y, axis=0, keepdims=True)
    ss = jnp.sum(y * y, axis=0, keepdims=True)
    fill = jnp.zeros((stats_ref.shape[0] - 2, s.shape[1]), jnp.float32)
    stats_ref[...] = jnp.concatenate([s, ss, fill], axis=0)


# ---------- Pass 2: recompute conv with BN folded into the weights ------------
def _conv_bn_kernel(p_ref, w_ref, shift_ref, o_ref):
    # y = patches @ (W * scale) + shift   (== BatchNorm(conv(x)))
    o_ref[...] = jnp.dot(p_ref[...], w_ref[...],
                         preferred_element_type=jnp.float32) + shift_ref[...]


def _choose_tile_rows(rows_needed):
    # Big tiles amortize the ~0.35 us per-grid-step overhead; keep >= 2 tiles
    # when the problem is large enough so v7x's two TensorCores both get work.
    if rows_needed >= 1024:
        num_tiles = max(2, _cdiv(rows_needed, 2048))
        return _round_up(_cdiv(rows_needed, num_tiles), 8)
    return _round_up(max(rows_needed, 8), 8)


def stem_forward(x_nchw, w_oihw, gamma, beta, *, stride=2, pad=1, eps=1e-5):
    """Conv2d(bias=False, stride=2, pad=1) + BatchNorm2d (batch stats)."""
    n, cin, h, w = x_nchw.shape
    cout, cin_w, kh, kw = w_oihw.shape
    assert cin == cin_w
    oh = (h + 2 * pad - kh) // stride + 1
    ow = (w + 2 * pad - kw) // stride + 1
    m = n * oh * ow                            # number of output pixels

    k_real = kh * kw * cin                     # 27
    kp = _round_up(k_real, 8)                  # 27 -> 32
    p_pack = 128 // kp if (kp <= 128 and 128 % kp == 0) else 1   # 4 pixels/row
    lanes = p_pack * cout                      # 256

    # ---- wrapper-side im2col: single concatenate builds the K-padded slab ----
    x_nhwc = jnp.transpose(x_nchw, (0, 2, 3, 1)).astype(jnp.float32)
    x_pad = jnp.pad(x_nhwc, ((0, 0), (pad, pad), (pad, pad), (0, 0)))
    taps = [x_pad[:, i:i + stride * oh:stride, j:j + stride * ow:stride, :]
            for i in range(kh) for j in range(kw)]
    if kp > k_real:
        taps.append(jnp.zeros((n, oh, ow, kp - k_real), jnp.float32))
    flat = jnp.concatenate(taps, axis=-1).reshape(m, kp)   # [M, 32]

    # ---- tiling over lane-rows (p_pack pixels per row) ------------------------
    rows_needed = _cdiv(m, p_pack)
    tile_rows = _choose_tile_rows(rows_needed)
    rows_pad = _round_up(rows_needed, tile_rows)
    num_tiles = rows_pad // tile_rows
    m_pad = rows_pad * p_pack
    if m_pad > m:
        flat = jnp.concatenate(
            [flat, jnp.zeros((m_pad - m, kp), jnp.float32)], axis=0)
    packed = flat.reshape(rows_pad, p_pack * kp)            # lane-dense [rows,128]

    # ---- weights: block-diagonal kron(I_P, W) ---------------------------------
    w_mat = jnp.transpose(w_oihw, (2, 3, 1, 0)).reshape(k_real, cout)
    w_mat = jnp.pad(w_mat.astype(jnp.float32), ((0, kp - k_real), (0, 0)))
    w_big = jnp.kron(jnp.eye(p_pack, dtype=jnp.float32), w_mat)  # [128, 256]

    vmem_bytes = 32 * 1024 * 1024   # covers double-buffered 2048-row tiles
    cparams = pltpu.CompilerParams(dimension_semantics=("parallel",),
                                   vmem_limit_bytes=vmem_bytes)

    # ---- pass 1: per-tile sum / sum-of-squares partials (no conv writeback) ---
    stats_out = pl.pallas_call(
        _stats_kernel,
        out_shape=jax.ShapeDtypeStruct((num_tiles * 8, lanes), jnp.float32),
        grid=(num_tiles,),
        in_specs=[
            pl.BlockSpec((tile_rows, p_pack * kp), lambda i: (i, 0)),
            pl.BlockSpec((p_pack * kp, lanes), lambda i: (0, 0)),
        ],
        out_specs=pl.BlockSpec((8, lanes), lambda i: (i, 0)),
        compiler_params=cparams,
    )(packed, w_big)

    # ---- tiny global stats combine + BN fold (padded rows contribute zeros) ---
    stats = stats_out.reshape(num_tiles, 8, lanes)
    tot_sum = jnp.sum(stats[:, 0, :], axis=0).reshape(p_pack, cout).sum(axis=0)
    tot_ssq = jnp.sum(stats[:, 1, :], axis=0).reshape(p_pack, cout).sum(axis=0)
    cnt = jnp.float32(m)
    mean = tot_sum / cnt
    var = jnp.maximum(tot_ssq / cnt - mean * mean, 0.0)
    scale = gamma.astype(jnp.float32) * jax.lax.rsqrt(var + eps)
    shift = beta.astype(jnp.float32) - mean * scale
    scale_p = jnp.tile(scale, p_pack)                       # [lanes]
    shift_p = jnp.tile(shift, p_pack).reshape(1, lanes)     # [1, lanes]
    w_big_scaled = w_big * scale_p[None, :]                 # BN folded into W

    # ---- pass 2: recompute conv with folded BN, write y once ------------------
    y_flat = pl.pallas_call(
        _conv_bn_kernel,
        out_shape=jax.ShapeDtypeStruct((rows_pad, lanes), jnp.float32),
        grid=(num_tiles,),
        in_specs=[
            pl.BlockSpec((tile_rows, p_pack * kp), lambda i: (i, 0)),
            pl.BlockSpec((p_pack * kp, lanes), lambda i: (0, 0)),
            pl.BlockSpec((1, lanes), lambda i: (0, 0)),
        ],
        out_specs=pl.BlockSpec((tile_rows, lanes), lambda i: (i, 0)),
        compiler_params=cparams,
    )(packed, w_big_scaled, shift_p)

    # Lane-packed slab is pixel-major / channel-minor, so a plain reshape
    # recovers [M, Cout]; drop padded rows, restore NCHW for PyTorch parity.
    y = y_flat.reshape(m_pad, cout)[:m].reshape(n, oh, ow, cout)
    return jnp.transpose(y, (0, 3, 1, 2))


def _reference(x_nchw, w_oihw, gamma, beta, *, stride=2, pad=1, eps=1e-5):
    y = jax.lax.conv_general_dilated(
        x_nchw.astype(jnp.float32), w_oihw.astype(jnp.float32),
        window_strides=(stride, stride), padding=((pad, pad), (pad, pad)),
        dimension_numbers=("NCHW", "OIHW", "NCHW"))
    mean = jnp.mean(y, axis=(0, 2, 3), keepdims=True)
    var = jnp.mean((y - mean) ** 2, axis=(0, 2, 3), keepdims=True)
    yhat = (y - mean) * jax.lax.rsqrt(var + eps)
    return yhat * gamma.reshape(1, -1, 1, 1) + beta.reshape(1, -1, 1, 1)


if __name__ == "__main__":
    # Small shapes consistent with the module: in_channels=3, out_channels=64.
    N, CIN, H, W = 2, 3, 16, 16
    COUT, K = 64, 3

    key = jax.random.PRNGKey(0)
    kx, kw = jax.random.split(key)
    x = jax.random.normal(kx, (N, CIN, H, W), dtype=jnp.float32)
    # Conv2d weight [out, in, kh, kw]; deterministic init.
    w = jax.random.normal(kw, (COUT, CIN, K, K), dtype=jnp.float32) * 0.1
    # BatchNorm2d(affine=True) init: gamma=1, beta=0.
    gamma = jnp.ones((COUT,), jnp.float32)
    beta = jnp.zeros((COUT,), jnp.float32)

    out = stem_forward(x, w, gamma, beta)
    out = jax.block_until_ready(out)

    ref = _reference(x, w, gamma, beta)
    assert out.shape == (N, COUT, H // 2, W // 2), out.shape
    assert jnp.allclose(out, ref, atol=1e-4, rtol=1e-4), float(
        jnp.max(jnp.abs(out - ref)))

    print("KERNEL_OK")
</pallas_src>

<mosaic_0001>
module attributes {stable_mosaic.version = 11 : i64} {
  func.func @_stats_kernel(%arg0: i32, %arg1: memref<32x128xf32, #tpu.memory_space<vmem>>, %arg2: memref<128x256xf32, #tpu.memory_space<vmem>>, %arg3: memref<8x256xf32, #tpu.memory_space<vmem>>) attributes {dimension_semantics = [#tpu.dimension_semantics<parallel>], iteration_bounds = array<i64: 1>, scalar_prefetch = 0 : i64, scratch_operands = 0 : i64, tpu.core_type = #tpu.core_type<tc>, window_params = [{transform_indices = @transform_0, window_bounds = array<i64: 32, 128>}, {pipeline_mode = #tpu.pipeline_mode<synchronous>, transform_indices = @transform_1, window_bounds = array<i64: 128, 256>}, {transform_indices = @transform_2, window_bounds = array<i64: 8, 256>}]} {
    %c0 = arith.constant 0 : index
    %c0_0 = arith.constant 0 : index
    %0 = vector.load %arg1[%c0, %c0_0] : memref<32x128xf32, #tpu.memory_space<vmem>>, vector<32x128xf32>
    %c0_1 = arith.constant 0 : index
    %c0_2 = arith.constant 0 : index
    %1 = vector.load %arg2[%c0_1, %c0_2] : memref<128x256xf32, #tpu.memory_space<vmem>>, vector<128x256xf32>
    %cst = arith.constant dense<0.000000e+00> : vector<32x256xf32>
    %2 = tpu.matmul %0, %1, %cst {dimension_numbers = #tpu.dot_dimension_numbers<[1], [0], [0], [1], [0, 0, 1, 1], [], []>} : vector<32x128xf32>, vector<128x256xf32>, vector<32x256xf32> -> vector<32x256xf32>
    %cst_3 = arith.constant dense<0.000000e+00> : vector<256xf32>
    %3 = vector.multi_reduction <add>, %2, %cst_3 [0] : vector<32x256xf32> to vector<256xf32>
    %4 = vector.shape_cast %3 : vector<256xf32> to vector<1x256xf32>
    %5 = arith.mulf %2, %2 : vector<32x256xf32>
    %cst_4 = arith.constant dense<0.000000e+00> : vector<256xf32>
    %6 = vector.multi_reduction <add>, %5, %cst_4 [0] : vector<32x256xf32> to vector<256xf32>
    %7 = vector.shape_cast %6 : vector<256xf32> to vector<1x256xf32>
    %cst_5 = arith.constant 0.000000e+00 : f32
    %8 = vector.broadcast %cst_5 : f32 to vector<6x256xf32>
    %9 = tpu.concatenate %4, %7, %8 in 0 : vector<1x256xf32>, vector<1x256xf32>, vector<6x256xf32> -> vector<8x256xf32>
    %c0_6 = arith.constant 0 : index
    %c0_7 = arith.constant 0 : index
    %10 = vector.load %arg3[%c0_6, %c0_7] : memref<8x256xf32, #tpu.memory_space<vmem>>, vector<8x256xf32>
    tpu.vector_store %arg3[%c0_6, %c0_7], %9 {strides = array<i32>} : memref<8x256xf32, #tpu.memory_space<vmem>>, vector<8x256xf32>,
    return
  }
  func.func @transform_0(%arg0: i32) -> (i32, i32) {
    %c0_i32 = arith.constant 0 : i32
    %c0_i32_0 = arith.constant 0 : i32
    return %arg0, %c0_i32 : i32, i32
  }
  func.func @transform_1(%arg0: i32) -> (i32, i32) {
    %c0_i32 = arith.constant 0 : i32
    %c0_i32_0 = arith.constant 0 : i32
    %c0_i32_1 = arith.constant 0 : i32
    return %c0_i32, %c0_i32_0 : i32, i32
  }
  func.func @transform_2(%arg0: i32) -> (i32, i32) {
    %c0_i32 = arith.constant 0 : i32
    %c0_i32_0 = arith.constant 0 : i32
    return %arg0, %c0_i32 : i32, i32
  }
}

</mosaic_0001>

<bundles_post_ra>
// kernel: tpu_custom_call.1
= control target key start
LH: loop header
LB: loop body
LE: loop exit
PB: predicated region body
PF: predicated region fallthrough
CT: control target
= control target key end

     0   :  { %7 = vsyncpa [#allocation3], 0  ;;  %s375_s0 = inlined_call_operand.hbm [shape: f32[32,128], index: 0, kind: input, shape index: {}]   ;;  %s376_s1 = inlined_call_operand.hbm [shape: f32[128,256], index: 1, kind: input, shape index: {}]   ;;  %s377_s2 = inlined_call_operand.hbm [shape: f32[8,256], index: 2, kind: output, shape index: {}]  }
   0x1   :  { %8 = vsyncpa [#allocation6], 0 }
   0x2   :  { %9 = vsyncpa [#allocation4], 0  ;;  %s339_s9 = smov [#allocation2]  }
   0x3   :  { %s15_s10 = sshll.u32 %s339_s9, 4  ;;  %s16_s10 = int_to_ptr.vmem [resolvable:$true] %s15_s10 }
   0x4   :  { %s281_s11 = scalar_lea.vmem %s16_s10, 512  ;;  %p286_p1 = scmp.lt.s32.totalorder %s16_s10, %s16_s10 }
   0x5   :  { %p282_p0 = scmp.ne.s32.totalorder %s16_s10, %s281_s11  ;;  %p287_p2 = scmp.lt.s32.totalorder %s281_s11, %s281_s11 }
   0x7   :  { %p288_p3 = por %p287_p2, %p286_p1 }
   0x9   :  { %p289_p4 = pnand %p288_p3, %p282_p0 }
   0xb   :  { %292 = shalt.err (!%p289_p4)
}
   0xc   :  { %s340_s12 = smov 128   ;;  %s341_s13 = smov 8  }
   0xd   :  { %21 = dma.hbm_to_vmem [thread:$0]  %s375_s0, 512, %s16_s10, [#allocation3], %s340_s12, %s340_s12, %s341_s13  }
   0xe   :  { %s342_s16 = smov [#allocation5]  }
   0xf   :  { %s27_s17 = sshll.u32 %s342_s16, 4  ;;  %s28_s17 = int_to_ptr.vmem [resolvable:$true] %s27_s17 }
  0x10   :  { %s301_s18 = scalar_lea.vmem %s28_s17, 4096  ;;  %p306_p6 = scmp.lt.s32.totalorder %s28_s17, %s28_s17 }
  0x11   :  { %p302_p5 = scmp.ne.s32.totalorder %s28_s17, %s301_s18  ;;  %p307_p7 = scmp.lt.s32.totalorder %s301_s18, %s301_s18 }
  0x13   :  { %p308_p8 = por %p307_p7, %p306_p6 }
  0x15   :  { %p309_p9 = pnand %p308_p8, %p302_p5 }
  0x17   :  { %312 = shalt.err (!%p309_p9)
}
  0x18   :  { %s343_s19 = smov 256   ;;  %s344_s20 = smov 16  }
  0x19   :  { %33 = dma.hbm_to_vmem [thread:$0]  %s376_s1, 4096, %s28_s17, [#allocation6], %s343_s19, %s343_s19, %s344_s20  }
  0x1a   :  { %333 = dma.done.wait [#allocation3], 512  }
  0x1b   :  { %334 = vsyncadd [#allocation3], 4294966784 }
  0x1c   :  { %335 = dma.done.wait [#allocation6], 4096  }
  0x1d   :  { %336 = vsyncadd [#allocation6], 4294963200  ;;  %v345_v0 = vmov 0.0   ;;  %v75_v1 = vld [vmem:[#allocation5 + $0xf8] sm:$0xff]  ;;  %v74_v2 = vld [vmem:[#allocation5 + $0xf0] sm:$0xff]  ;;  %vm209_vm0 = vcmask 1040384  }
  0x1e   :  { %140 = vmatprep.mubr.f32.mxu0 %v345_v0  ;;  %152 = vmatprep.mubr.f32.mxu1 %v345_v0  ;;  %v73_v3 = vld [vmem:[#allocation5 + $0xe8] sm:$0xff]  ;;  %v72_v4 = vld [vmem:[#allocation5 + $0xe0] sm:$0xff]  ;;  %v71_v5 = vld [vmem:[#allocation5 + $0xd8] sm:$0xff]  ;;  %vm212_vm1 = vcmask 1041408   ;;  %s346_s0 = smov [#allocation7]  }
  0x1f   :  { %76 = vmatprep.subr.mxu0 %v75_v1  ;;  %233 = vmatprep.subr.mxu1 %v75_v1  ;;  %v70_v6 = vld [vmem:[#allocation5 + $0xd0] sm:$0xff]  ;;  %v69_v7 = vld [vmem:[#allocation5 + $0xc8] sm:$0xff]  ;;  %v68_v8 = vld [vmem:[#allocation5 + $0xc0] sm:$0xff]  ;;  %s223_s1 = sshll.u32 %s346_s0, 4  ;;  %s224_s1 = int_to_ptr.vmem [resolvable:$true] %s223_s1 }
  0x20   :  { %77 = vmatpush1.msra.mxu0 %v74_v2  ;;  %249 = vmatpush1.msra.mxu1 %v74_v2  ;;  %v67_v9 = vld [vmem:[#allocation5 + $0xb8] sm:$0xff]  ;;  %v66_v10 = vld [vmem:[#allocation5 + $0xb0] sm:$0xff]  ;;  %v65_v11 = vld [vmem:[#allocation5 + $0xa8] sm:$0xff]  ;;  %s313_s23 = scalar_lea.vmem %s224_s1, 256  ;;  %p318_p11 = scmp.lt.s32.totalorder %s224_s1, %s224_s1 }
  0x21   :  { %78 = vmatprep.subr.mxu0 %v73_v3  ;;  %234 = vmatprep.subr.mxu1 %v73_v3  ;;  %v64_v12 = vld [vmem:[#allocation5 + $0xa0] sm:$0xff]  ;;  %v63_v13 = vld [vmem:[#allocation5 + $0x98] sm:$0xff]  ;;  %v62_v14 = vld [vmem:[#allocation5 + $0x90] sm:$0xff]  ;;  %p314_p10 = scmp.ne.s32.totalorder %s224_s1, %s313_s23  ;;  %p319_p12 = scmp.lt.s32.totalorder %s313_s23, %s313_s23 }
  0x22   :  { %79 = vmatpush1.msra.mxu0 %v72_v4  ;;  %250 = vmatpush1.msra.mxu1 %v72_v4  ;;  %v61_v15 = vld [vmem:[#allocation5 + $0x88] sm:$0xff]  ;;  %v60_v16 = vld [vmem:[#allocation5 + $0x80] sm:$0xff]  ;;  %v59_v17 = vld [vmem:[#allocation5 + $0x78] sm:$0xff] }
  0x23   :  { %80 = vmatprep.subr.mxu0 %v71_v5  ;;  %235 = vmatprep.subr.mxu1 %v71_v5  ;;  %v58_v18 = vld [vmem:[#allocation5 + $0x70] sm:$0xff]  ;;  %v57_v19 = vld [vmem:[#allocation5 + $0x68] sm:$0xff]  ;;  %v56_v20 = vld [vmem:[#allocation5 + $0x60] sm:$0xff]  ;;  %p320_p13 = por %p319_p12, %p318_p11 }
  0x24   :  { %81 = vmatpush1.msra.mxu0 %v70_v6  ;;  %251 = vmatpush1.msra.mxu1 %v70_v6  ;;  %v55_v21 = vld [vmem:[#allocation5 + $0x58] sm:$0xff]  ;;  %v54_v22 = vld [vmem:[#allocation5 + $0x50] sm:$0xff]  ;;  %v53_v23 = vld [vmem:[#allocation5 + $0x48] sm:$0xff] }
  0x25   :  { %82 = vmatprep.subr.mxu0 %v69_v7  ;;  %236 = vmatprep.subr.mxu1 %v69_v7  ;;  %v52_v24 = vld [vmem:[#allocation5 + $0x40] sm:$0xff]  ;;  %v51_v25 = vld [vmem:[#allocation5 + $0x38] sm:$0xff]  ;;  %v50_v26 = vld [vmem:[#allocation5 + $0x30] sm:$0xff]  ;;  %p321_p0 = pnand %p320_p13, %p314_p10 }
  0x26   :  { %83 = vmatpush1.msra.mxu0 %v68_v8  ;;  %252 = vmatpush1.msra.mxu1 %v68_v8  ;;  %v49_v27 = vld [vmem:[#allocation5 + $0x28] sm:$0xff]  ;;  %v48_v28 = vld [vmem:[#allocation5 + $0x20] sm:$0xff]  ;;  %v47_v29 = vld [vmem:[#allocation5 + $0x18] sm:$0xff] }
  0x27   :  { %84 = vmatprep.subr.mxu0 %v67_v9  ;;  %237 = vmatprep.subr.mxu1 %v67_v9  ;;  %v46_v30 = vld [vmem:[#allocation5 + $0x10] sm:$0xff]  ;;  %v45_v31 = vld [vmem:[#allocation5 + $0x8] sm:$0xff]  ;;  %v44_v32 = vld [vmem:[#allocation5] sm:$0xff] }
  0x28   :  { %85 = vmatpush1.msra.mxu0 %v66_v10  ;;  %253 = vmatpush1.msra.mxu1 %v66_v10  ;;  %v40_v33 = vld [vmem:[#allocation2] sm:$0xff]  ;;  %v42_v34 = vld [vmem:[#allocation2 + $0x10] sm:$0xff]  ;;  %v41_v35 = vld [vmem:[#allocation2 + $0x8] sm:$0xff] }
  0x29   :  { %86 = vmatprep.subr.mxu0 %v65_v11  ;;  %238 = vmatprep.subr.mxu1 %v65_v11  ;;  %v43_v36 = vld [vmem:[#allocation2 + $0x18] sm:$0xff] }
  0x2a   :  { %87 = vmatpush1.msra.mxu0 %v64_v12  ;;  %254 = vmatpush1.msra.mxu1 %v64_v12 }
  0x2b   :  { %88 = vmatprep.subr.mxu0 %v63_v13  ;;  %239 = vmatprep.subr.mxu1 %v63_v13 }
  0x2c   :  { %89 = vmatpush1.msra.mxu0 %v62_v14  ;;  %255 = vmatpush1.msra.mxu1 %v62_v14 }
  0x2d   :  { %90 = vmatprep.subr.mxu0 %v61_v15  ;;  %240 = vmatprep.subr.mxu1 %v61_v15 }
  0x2e   :  { %91 = vmatpush1.msra.mxu0 %v60_v16  ;;  %256 = vmatpush1.msra.mxu1 %v60_v16 }
  0x2f   :  { %92 = vmatprep.subr.mxu0 %v59_v17  ;;  %241 = vmatprep.subr.mxu1 %v59_v17 }
  0x30   :  { %93 = vmatpush1.msra.mxu0 %v58_v18  ;;  %257 = vmatpush1.msra.mxu1 %v58_v18 }
  0x31   :  { %94 = vmatprep.subr.mxu0 %v57_v19  ;;  %242 = vmatprep.subr.mxu1 %v57_v19 }
  0x32   :  { %95 = vmatpush1.msra.mxu0 %v56_v20  ;;  %258 = vmatpush1.msra.mxu1 %v56_v20 }
  0x33   :  { %96 = vmatprep.subr.mxu0 %v55_v21  ;;  %243 = vmatprep.subr.mxu1 %v55_v21 }
  0x34   :  { %97 = vmatpush1.msra.mxu0 %v54_v22  ;;  %259 = vmatpush1.msra.mxu1 %v54_v22 }
  0x35   :  { %98 = vmatprep.subr.mxu0 %v53_v23  ;;  %244 = vmatprep.subr.mxu1 %v53_v23 }
  0x36   :  { %99 = vmatpush1.msra.mxu0 %v52_v24  ;;  %260 = vmatpush1.msra.mxu1 %v52_v24 }
  0x37   :  { %100 = vmatprep.subr.mxu0 %v51_v25  ;;  %245 = vmatprep.subr.mxu1 %v51_v25 }
  0x38   :  { %101 = vmatpush1.msra.mxu0 %v50_v26  ;;  %261 = vmatpush1.msra.mxu1 %v50_v26 }
  0x39   :  { %102 = vmatprep.subr.mxu0 %v49_v27  ;;  %246 = vmatprep.subr.mxu1 %v49_v27 }
  0x3a   :  { %103 = vmatpush1.msra.mxu0 %v48_v28  ;;  %262 = vmatpush1.msra.mxu1 %v48_v28 }
  0x3b   :  { %104 = vmatprep.subr.mxu0 %v47_v29  ;;  %247 = vmatprep.subr.mxu1 %v47_v29 }
  0x3c   :  { %105 = vmatpush1.msra.mxu0 %v46_v30  ;;  %263 = vmatpush1.msra.mxu1 %v46_v30 }
  0x3d   :  { %106 = vmatprep.subr.mxu0 %v45_v31  ;;  %248 = vmatprep.subr.mxu1 %v45_v31 }
  0x3e   :  { %107 = vmatpush1.msra.mxu0 %v44_v32  ;;  %264 = vmatpush1.msra.mxu1 %v44_v32 }
  0x3f   :  { %141 = vmatmul.mubr.f32.vlgmr.msra.gmra.mxu0 %v40_v33  ;;  %153 = vmatmul.mubr.f32.vlgmr.msra.gmra.mxu1 %v42_v34 }
  0x40   :  { %146 = vmatprep.mubr.f32.mxu0 %v345_v0  ;;  %158 = vmatprep.mubr.f32.mxu1 %v345_v0 }
  0x43   :  { %147 = vmatmul.mubr.f32.gmra.mxu0 %v41_v35  ;;  %159 = vmatmul.mubr.f32.gmra.mxu1 %v43_v36 }
  0xff   :  { %v142_v37 = vpop.f32.mrf.mxu0  ;;  %v154_v38 = vpop.f32.mrf.mxu1 }
 0x100   :  { %v183_v43 = vmul.f32 %v142_v37, %v142_v37  ;;  %v187_v47 = vmul.f32 %v154_v38, %v154_v38 }
 0x101   :  { %v144_v39 = vpop.f32.mrf.mxu0  ;;  %v156_v40 = vpop.f32.mrf.mxu1 }
 0x102   :  { %v184_v46 = vmul.f32 %v144_v39, %v144_v39  ;;  %v188_v55 = vmul.f32 %v156_v40, %v156_v40 }
 0x103   :  { %v148_v41 = vpop.f32.mrf.mxu0  ;;  %v160_v42 = vpop.f32.mrf.mxu1 }
 0x104   :  { %v165_v44 = vadd.f32 %v148_v41, %v142_v37  ;;  %v185_v45 = vmul.f32 %v148_v41, %v148_v41  ;;  %v189_v49 = vmul.f32 %v160_v42, %v160_v42 }
 0x105   :  { %v150_v48 = vpop.f32.mrf.mxu0  ;;  %v162_v54 = vpop.f32.mrf.mxu1 }
 0x106   :  { %v191_v50 = vadd.f32 %v185_v45, %v183_v43  ;;  %v174_v51 = vadd.f32 %v150_v48, %v144_v39  ;;  %v186_v52 = vmul.f32 %v150_v48, %v150_v48  ;;  %v166_v53 = vadd.f32 %v165_v44, %v154_v38 }
 0x107   :  { %v190_v60 = vmul.f32 %v162_v54, %v162_v54 }
 0x108   :  { %v200_v56 = vadd.f32 %v186_v52, %v184_v46  ;;  %v167_v57 = vadd.f32 %v166_v53, %v160_v42  ;;  %v192_v58 = vadd.f32 %v191_v50, %v187_v47  ;;  %v175_v59 = vadd.f32 %v174_v51, %v156_v40 }
 0x10a   :  { %v168_v61 = vrot.slane %v167_v57, 4  ;;  %v193_v62 = vadd.f32 %v192_v58, %v189_v49  ;;  %v176_v63 = vadd.f32 %v175_v59, %v162_v54  ;;  %v201_v0 = vadd.f32 %v200_v56, %v188_v55 }
 0x10c   :  { %v169_v1 = vadd.f32 %v168_v61, %v167_v57  ;;  %v194_v2 = vrot.slane %v193_v62, 4  ;;  %v177_v3 = vrot.slane %v176_v63, 4  ;;  %v202_v4 = vadd.f32 %v201_v0, %v190_v60 }
 0x10e   :  { %v170_v5 = vrot.slane %v169_v1, 2  ;;  %v195_v6 = vadd.f32 %v194_v2, %v193_v62  ;;  %v178_v7 = vadd.f32 %v177_v3, %v176_v63  ;;  %v203_v8 = vrot.slane %v202_v4, 4 }
 0x110   :  { %v171_v9 = vadd.f32 %v170_v5, %v169_v1  ;;  %v196_v10 = vrot.slane %v195_v6, 2  ;;  %v179_v11 = vrot.slane %v178_v7, 2  ;;  %v204_v12 = vadd.f32 %v203_v8, %v202_v4 }
 0x112   :  { %v172_v13 = vrot.slane %v171_v9, 1  ;;  %v197_v14 = vadd.f32 %v196_v10, %v195_v6  ;;  %v180_v15 = vadd.f32 %v179_v11, %v178_v7  ;;  %v205_v16 = vrot.slane %v204_v12, 2 }
 0x114   :  { %v198_v17 = vrot.slane %v197_v14, 1  ;;  %v181_v18 = vrot.slane %v180_v15, 1  ;;  %v206_v19 = vadd.f32 %v205_v16, %v204_v12  ;;  %v173_v20 = vadd.f32 %v172_v13, %v171_v9 }
 0x116   :  { %v199_v21 = vadd.f32 %v198_v17, %v197_v14  ;;  %v207_v22 = vrot.slane %v206_v19, 1  ;;  %v182_v23 = vadd.f32 %v181_v18, %v180_v15 }
 0x118   :  { %v208_v24 = vadd.f32 %v207_v22, %v206_v19  ;;  %v210_v25 = vsel %vm209_vm0, %v173_v20, %v199_v21 }
 0x119   :  { %v213_v26 = vsel %vm212_vm1, %v210_v25, 0.0 }
 0x11a   :  { %v211_v27 = vsel %vm209_vm0, %v182_v23, %v208_v24  ;;  %215 = vst [vmem:[#allocation7] sm:$0xff] %v213_v26 }
 0x11b   :  { %v214_v28 = vsel %vm212_vm1, %v211_v27, 0.0 }
 0x11c   :  { %216 = vst [vmem:[#allocation7 + $0x8] sm:$0xff] %v214_v28 }
 0x11d   :  { %324 = shalt.err (!%p321_p0)
}
 0x11e   :  { %226 = dma.vmem_to_hbm [thread:$0]  %s224_s1, 256, %s377_s2, [#allocation4]  }
 0x11f   :  { %337 = dma.done.wait [#allocation4], 256  }
 0x120   :  { %338 = vsyncadd [#allocation4], 4294967040 }
 0x121   :  { %230 = vsyncpa [#allocation3], 1 }
 0x122   :  { %231 = vsyncpa [#allocation6], 1 }
 0x123   :  { %232 = vsyncpa [#allocation4], 1 }

</bundles_post_ra>
